<compile_context>
chip_gen: v5e
topology: v5e:2x2
jax: 0.10.0
libtpu: 0.0.40
codegen_flags: <defaults>
</compile_context>

<pallas_src>
import jax
import jax.numpy as jnp
from jax.experimental import pallas as pl
from jax.experimental.pallas import tpu as pltpu


def _patch_proj_kernel(x_ref, w_ref, b_ref, o_ref):
    # x_ref: (tm, K)  w_ref: (K, E)  b_ref: (1, E) f32  o_ref: (tm, E)
    acc = jnp.dot(x_ref[...], w_ref[...], preferred_element_type=jnp.float32)
    o_ref[...] = (acc + b_ref[...]).astype(o_ref.dtype)


def _vmem_capacity_bytes():
    try:
        return int(pltpu.get_tpu_info().vmem_capacity_bytes)
    except Exception:
        return 64 * 1024 * 1024  # conservative: v7x per-TensorCore VMEM


_ROW = 16  # row-tile granularity that covers f32 (8) and bf16 (16) sublane tiles


def _choose_tm(M, K, E, in_bytes, out_bytes, vmem_budget):
    """Row tile: as large as the double-buffered pipeline allows inside
    `vmem_budget`, keeping >= 2 grid steps (v7x has 2 TensorCores) and
    preferring an exact divisor of M (no ragged edge, no padding, no slice)."""
    if M <= _ROW:
        return M                                  # single full block (== array dim)
    resident = K * E * in_bytes + E * 4           # weight + bias (single-buffered)
    per_row = 2 * (K * in_bytes + E * out_bytes)  # x + out rows, double-buffered
    cap = (vmem_budget - resident) // max(per_row, 1)
    cap = int(min(max(cap, _ROW), 2048))          # >2048 rows: diminishing returns
    # >= 2 grid steps so v7x's second TensorCore gets work; target >= 8 steps
    # for pipeline depth once the problem is big enough to afford it.
    cap = min(cap, max(512, -(-M // 8)))
    cap = min(cap, max(_ROW, M // 2))
    cap = max(_ROW, (cap // _ROW) * _ROW)
    # Prefer an exact divisor of M; don't shrink the tile more than ~2x for it.
    lo = max(_ROW, (cap // 2 // _ROW) * _ROW)
    for cand in range(cap, lo - 1, -_ROW):
        if M % cand == 0:
            return cand
    return cap                                    # ragged last block via pl.cdiv


def prepare_patch_embed_params(weight, bias, compute_dtype=jnp.bfloat16):
    """Hoist per-call weight prep (reshape/transpose/cast) out of hot loops:
    call once, pass the result via `params=` to patch_embed_3d."""
    E = weight.shape[0]
    K = int(weight.size) // E
    w_mat = weight.reshape(E, K).T.astype(compute_dtype)   # (K, E)
    b_row = bias.astype(jnp.float32).reshape(1, E)
    return w_mat, b_row


def patch_embed_3d(x, weight=None, bias=None, patch_size=(2, 4, 4), flatten=True,
                   compute_dtype=jnp.bfloat16, out_dtype=jnp.bfloat16, params=None):
    """PatchEmbed3D forward (norm_layer=None, the module default).

    x: (B, C, D, H, W); weight: (E, C, pt, ph, pw); bias: (E,).
    Note: matmul operands are cast to `compute_dtype` (bf16) with f32 MXU
    accumulation and the result is stored as `out_dtype` (bf16) — this changes
    numerics vs the f32 Conv3d reference (~1e-3 abs for typical scales); pass
    compute_dtype=jnp.float32, out_dtype=x.dtype for module-exact behaviour.
    """
    pt, ph, pw = patch_size
    B, C, D, H, W = x.shape

    # Pad spatial dims up to multiples of the patch size (matches the F.pad calls).
    pad_d = (-D) % pt
    pad_h = (-H) % ph
    pad_w = (-W) % pw
    if pad_d or pad_h or pad_w:
        x = jnp.pad(x, ((0, 0), (0, 0), (0, pad_d), (0, pad_h), (0, pad_w)))
    D2, H2, W2 = D + pad_d, H + pad_h, W + pad_w
    nd, nh, nw = D2 // pt, H2 // ph, W2 // pw

    K = C * pt * ph * pw
    M = B * nd * nh * nw

    # Patch extraction: the (C, pt, ph, pw) flatten order matches the flattened
    # Conv3d weight; reshape + transpose + cast fuse into one XLA copy pass.
    # TODO(synk): fusing this extraction into the kernel (grid over (B, nd, nh)
    # with an NCDHW slab and in-VMEM relayout) would save one HBM pass over x,
    # but the required 6-D transpose does not lower reliably in Mosaic.
    xp = x.reshape(B, C, nd, pt, nh, ph, nw, pw)
    xp = xp.transpose(0, 2, 4, 6, 1, 3, 5, 7).reshape(M, K).astype(compute_dtype)

    if params is None:
        w_mat, b_row = prepare_patch_embed_params(weight, bias, compute_dtype)
    else:
        w_mat, b_row = params
    E = w_mat.shape[1]

    in_bytes = jnp.dtype(compute_dtype).itemsize
    out_bytes = jnp.dtype(out_dtype).itemsize

    # Unified VMEM budget: clamp the limit to <= 48 MiB (safe even if the query
    # reports per-chip VMEM on v7x, plenty for this skinny-K GEMM on v5e/v6e),
    # and size the tile from the same number minus ~25% Mosaic headroom.
    vmem_cap = _vmem_capacity_bytes()
    vmem_limit = max(16 * 1024 * 1024, min(vmem_cap * 3 // 4, 48 * 1024 * 1024))
    tm = _choose_tm(M, K, E, in_bytes, out_bytes, vmem_budget=vmem_limit * 3 // 4)

    cost = pl.CostEstimate(
        flops=2 * M * K * E,
        transcendentals=0,
        bytes_accessed=M * K * in_bytes + K * E * in_bytes + E * 4 + M * E * out_bytes,
    )

    def build(single_buffer_params):
        wkw = dict(pipeline_mode=pl.Buffered(1)) if single_buffer_params else {}
        return pl.pallas_call(
            _patch_proj_kernel,
            out_shape=jax.ShapeDtypeStruct((M, E), out_dtype),
            grid_spec=pltpu.PrefetchScalarGridSpec(
                num_scalar_prefetch=0,
                grid=(pl.cdiv(M, tm),),
                in_specs=[
                    pl.BlockSpec((tm, K), lambda i: (i, 0)),
                    pl.BlockSpec((K, E), lambda i: (0, 0), **wkw),  # grid-invariant
                    pl.BlockSpec((1, E), lambda i: (0, 0), **wkw),  # grid-invariant
                ],
                out_specs=pl.BlockSpec((tm, E), lambda i: (i, 0)),
            ),
            compiler_params=pltpu.CompilerParams(
                dimension_semantics=("parallel",),
                vmem_limit_bytes=int(vmem_limit),
            ),
            cost_estimate=cost,
        )

    try:
        out = build(True)(xp, w_mat, b_row)
    except Exception:
        # This JAX build rejects single-buffered (pl.Buffered(1)) grid-invariant
        # operands -> fall back to default double-buffering (tiny VMEM cost).
        out = build(False)(xp, w_mat, b_row)

    if flatten:
        # (B, N_patches, E) == conv_out.flatten(2).transpose(1, 2)
        return out.reshape(B, nd * nh * nw, E)
    # Non-flattened: (B, E, nd, nh, nw), matching Conv3d NCDHW output.
    return out.reshape(B, nd, nh, nw, E).transpose(0, 4, 1, 2, 3)
    # TODO(synk): norm_layer (LayerNorm over embed_dim) not implemented — the
    # module default norm_layer=None is what we reproduce.


if __name__ == "__main__":
    key = jax.random.PRNGKey(0)
    k_x, k_w, k_b = jax.random.split(key, 3)

    # Small shapes consistent with the module: patch_size=(2,4,4)
    B, C, D, H, W = 2, 4, 4, 16, 16
    E = 32
    patch_size = (2, 4, 4)

    x = jax.random.normal(k_x, (B, C, D, H, W), dtype=jnp.float32)
    weight = jax.random.normal(k_w, (E, C) + patch_size, dtype=jnp.float32) * 0.02
    bias = jax.random.normal(k_b, (E,), dtype=jnp.float32) * 0.02

    def ref_fn(x_in):
        pt, ph, pw = patch_size
        pd = (-x_in.shape[2]) % pt
        phh = (-x_in.shape[3]) % ph
        pww = (-x_in.shape[4]) % pw
        xpad = jnp.pad(x_in, ((0, 0), (0, 0), (0, pd), (0, phh), (0, pww)))
        r = jax.lax.conv_general_dilated(
            xpad, weight, window_strides=patch_size, padding="VALID",
            dimension_numbers=("NCDHW", "OIDHW", "NCDHW"),
        ) + bias.reshape(1, E, 1, 1, 1)
        return r.reshape(r.shape[0], E, -1).transpose(0, 2, 1)

    out = patch_embed_3d(x, weight, bias, patch_size=patch_size, flatten=True)
    out = jax.block_until_ready(out)
    ref = ref_fn(x)
    assert out.shape == ref.shape, (out.shape, ref.shape)
    # bf16 operands + bf16 output (f32 accumulation) -> loosened tolerance vs f32 ref.
    assert jnp.allclose(out.astype(jnp.float32), ref, atol=2e-2, rtol=2e-2), float(
        jnp.max(jnp.abs(out.astype(jnp.float32) - ref)))

    # Pre-prepared (hoisted) weights + the non-divisible-spatial padding path.
    params = prepare_patch_embed_params(weight, bias)
    x2 = jax.random.normal(k_x, (B, C, 3, 14, 15), dtype=jnp.float32)
    out2 = jax.block_until_ready(
        patch_embed_3d(x2, patch_size=patch_size, flatten=True, params=params))
    ref2 = ref_fn(x2)
    assert out2.shape == ref2.shape, (out2.shape, ref2.shape)
    assert jnp.allclose(out2.astype(jnp.float32), ref2, atol=2e-2, rtol=2e-2), float(
        jnp.max(jnp.abs(out2.astype(jnp.float32) - ref2)))

    print("KERNEL_OK")
</pallas_src>

<mosaic_0001>
module attributes {stable_mosaic.version = 11 : i64} {
  func.func @_patch_proj_kernel(%arg0: i32, %arg1: memref<32x128xbf16, #tpu.memory_space<vmem>>, %arg2: memref<128x32xbf16, #tpu.memory_space<vmem>>, %arg3: memref<1x32xf32, #tpu.memory_space<vmem>>, %arg4: memref<32x32xbf16, #tpu.memory_space<vmem>>) attributes {dimension_semantics = [#tpu.dimension_semantics<parallel>], iteration_bounds = array<i64: 2>, scalar_prefetch = 0 : i64, scratch_operands = 0 : i64, tpu.core_type = #tpu.core_type<tc>, window_params = [{transform_indices = @transform_0, window_bounds = array<i64: 32, 128>}, {pipeline_mode = #tpu.pipeline_mode<synchronous>, transform_indices = @transform_1, window_bounds = array<i64: 128, 32>}, {pipeline_mode = #tpu.pipeline_mode<synchronous>, transform_indices = @transform_2, window_bounds = array<i64: 1, 32>}, {transform_indices = @transform_3, window_bounds = array<i64: 32, 32>}]} {
    %c0 = arith.constant 0 : index
    %c0_0 = arith.constant 0 : index
    %0 = vector.load %arg1[%c0, %c0_0] : memref<32x128xbf16, #tpu.memory_space<vmem>>, vector<32x128xbf16>
    %c0_1 = arith.constant 0 : index
    %c0_2 = arith.constant 0 : index
    %1 = vector.load %arg2[%c0_1, %c0_2] : memref<128x32xbf16, #tpu.memory_space<vmem>>, vector<128x32xbf16>
    %cst = arith.constant dense<0.000000e+00> : vector<32x32xf32>
    %2 = tpu.matmul %0, %1, %cst {dimension_numbers = #tpu.dot_dimension_numbers<[1], [0], [0], [1], [0, 0, 1, 1], [], []>} : vector<32x128xbf16>, vector<128x32xbf16>, vector<32x32xf32> -> vector<32x32xf32>
    %c0_3 = arith.constant 0 : index
    %c0_4 = arith.constant 0 : index
    %3 = vector.load %arg3[%c0_3, %c0_4] : memref<1x32xf32, #tpu.memory_space<vmem>>, vector<1x32xf32>
    %4 = vector.broadcast %3 : vector<1x32xf32> to vector<32x32xf32>
    %5 = arith.addf %2, %4 : vector<32x32xf32>
    %6 = arith.truncf %5 : vector<32x32xf32> to vector<32x32xbf16>
    %c0_5 = arith.constant 0 : index
    %c0_6 = arith.constant 0 : index
    %7 = vector.load %arg4[%c0_5, %c0_6] : memref<32x32xbf16, #tpu.memory_space<vmem>>, vector<32x32xbf16>
    tpu.vector_store %arg4[%c0_5, %c0_6], %6 {strides = array<i32>} : memref<32x32xbf16, #tpu.memory_space<vmem>>, vector<32x32xbf16>,
    return
  }
  func.func @transform_0(%arg0: i32) -> (i32, i32) {
    %c0_i32 = arith.constant 0 : i32
    %c0_i32_0 = arith.constant 0 : i32
    return %arg0, %c0_i32 : i32, i32
  }
  func.func @transform_1(%arg0: i32) -> (i32, i32) {
    %c0_i32 = arith.constant 0 : i32
    %c0_i32_0 = arith.constant 0 : i32
    %c0_i32_1 = arith.constant 0 : i32
    return %c0_i32, %c0_i32_0 : i32, i32
  }
  func.func @transform_2(%arg0: i32) -> (i32, i32) {
    %c0_i32 = arith.constant 0 : i32
    %c0_i32_0 = arith.constant 0 : i32
    %c0_i32_1 = arith.constant 0 : i32
    return %c0_i32, %c0_i32_0 : i32, i32
  }
  func.func @transform_3(%arg0: i32) -> (i32, i32) {
    %c0_i32 = arith.constant 0 : i32
    %c0_i32_0 = arith.constant 0 : i32
    return %arg0, %c0_i32 : i32, i32
  }
}

module attributes {stable_mosaic.version = 11 : i64} {
  func.func @_patch_proj_kernel(%arg0: i32, %arg1: memref<32x128xbf16, #tpu.memory_space<vmem>>, %arg2: memref<128x32xbf16, #tpu.memory_space<vmem>>, %arg3: memref<1x32xf32, #tpu.memory_space<vmem>>, %arg4: memref<32x32xbf16, #tpu.memory_space<vmem>>) attributes {dimension_semantics = [#tpu.dimension_semantics<parallel>], iteration_bounds = array<i64: 2>, scalar_prefetch = 0 : i64, scratch_operands = 0 : i64, tpu.core_type = #tpu.core_type<tc>, window_params = [{transform_indices = @transform_0, window_bounds = array<i64: 32, 128>}, {pipeline_mode = #tpu.pipeline_mode<synchronous>, transform_indices = @transform_1, window_bounds = array<i64: 128, 32>}, {pipeline_mode = #tpu.pipeline_mode<synchronous>, transform_indices = @transform_2, window_bounds = array<i64: 1, 32>}, {transform_indices = @transform_3, window_bounds = array<i64: 32, 32>}]} {
    %c0 = arith.constant 0 : index
    %c0_0 = arith.constant 0 : index
    %0 = vector.load %arg1[%c0, %c0_0] : memref<32x128xbf16, #tpu.memory_space<vmem>>, vector<32x128xbf16>
    %c0_1 = arith.constant 0 : index
    %c0_2 = arith.constant 0 : index
    %1 = vector.load %arg2[%c0_1, %c0_2] : memref<128x32xbf16, #tpu.memory_space<vmem>>, vector<128x32xbf16>
    %cst = arith.constant dense<0.000000e+00> : vector<32x32xf32>
    %2 = tpu.matmul %0, %1, %cst {dimension_numbers = #tpu.dot_dimension_numbers<[1], [0], [0], [1], [0, 0, 1, 1], [], []>} : vector<32x128xbf16>, vector<128x32xbf16>, vector<32x32xf32> -> vector<32x32xf32>
    %c0_3 = arith.constant 0 : index
    %c0_4 = arith.constant 0 : index
    %3 = vector.load %arg3[%c0_3, %c0_4] : memref<1x32xf32, #tpu.memory_space<vmem>>, vector<1x32xf32>
    %4 = vector.broadcast %3 : vector<1x32xf32> to vector<32x32xf32>
    %5 = arith.addf %2, %4 : vector<32x32xf32>
    %6 = arith.truncf %5 : vector<32x32xf32> to vector<32x32xbf16>
    %c0_5 = arith.constant 0 : index
    %c0_6 = arith.constant 0 : index
    %7 = vector.load %arg4[%c0_5, %c0_6] : memref<32x32xbf16, #tpu.memory_space<vmem>>, vector<32x32xbf16>
    tpu.vector_store %arg4[%c0_5, %c0_6], %6 {strides = array<i32>} : memref<32x32xbf16, #tpu.memory_space<vmem>>, vector<32x32xbf16>,
    return
  }
  func.func @transform_0(%arg0: i32) -> (i32, i32) {
    %c0_i32 = arith.constant 0 : i32
    %c0_i32_0 = arith.constant 0 : i32
    return %arg0, %c0_i32 : i32, i32
  }
  func.func @transform_1(%arg0: i32) -> (i32, i32) {
    %c0_i32 = arith.constant 0 : i32
    %c0_i32_0 = arith.constant 0 : i32
    %c0_i32_1 = arith.constant 0 : i32
    return %c0_i32, %c0_i32_0 : i32, i32
  }
  func.func @transform_2(%arg0: i32) -> (i32, i32) {
    %c0_i32 = arith.constant 0 : i32
    %c0_i32_0 = arith.constant 0 : i32
    %c0_i32_1 = arith.constant 0 : i32
    return %c0_i32, %c0_i32_0 : i32, i32
  }
  func.func @transform_3(%arg0: i32) -> (i32, i32) {
    %c0_i32 = arith.constant 0 : i32
    %c0_i32_0 = arith.constant 0 : i32
    return %arg0, %c0_i32 : i32, i32
  }
}

</mosaic_0001>

<bundles_post_ra>
// kernel: tpu_custom_call.1
= control target key start
LH: loop header
LB: loop body
LE: loop exit
PB: predicated region body
PF: predicated region fallthrough
CT: control target
= control target key end

     0   :  { %s448_s12 = smov 0   ;;  %s492_s0 = inlined_call_operand.vmem [shape: bf16[64,128], index: 0, kind: input, shape index: {}]   ;;  %s493_s1 = inlined_call_operand.vmem [shape: bf16[128,32], index: 1, kind: input, shape index: {}]   ;;  %s494_s2 = inlined_call_operand.vmem [shape: f32[1,32], index: 2, kind: input, shape index: {}]   ;;  %s495_s3 = inlined_call_operand.vmem [shape: bf16[64,32], index: 3, kind: output, shape index: {}]  }
   0x1 LB: > { %s342_s13 = sadd.s32 4294967295, %s426_s12   ;;  %p346_p0 = scmp.ge.s32.totalorder %s426_s12, 1  ;;  %s426_s12 = sphi %s448_s12, %s13_s12  }
   0x2   : > { %p138_p1 = scmp.lt.s32.totalorder %s426_s12, 3 }
   0x4   : > { %p139_p2 = pnand %p346_p0, %p138_p1 }
   0x5   : > { %s347_s22 = sshll.u32 (!%p139_p2), %s342_s13, 2 }
   0x6   : > { %142 = sbr.rel (%p139_p2) target bundleno = 183 (0xb7), region = 32  ;;  %p163_p3 = scmp.lt.s32.totalorder (!%p139_p2), %s347_s22, 7 }
   0xb   : > { %v402_v0 = vld [vmem:[%s493_s1 + $0x38] sm:$0xff]  ;;  %v401_v1 = vld [vmem:[%s493_s1 + $0x30] sm:$0xff]  ;;  %v400_v2 = vld [vmem:[%s493_s1 + $0x28] sm:$0xff]  ;;  %s497_s22 = smov (!%p163_p3, %s347_s22), 7  ;;  %vm281_vm0 = vcmask 257024  }
   0xc   : > { %258 = vmatpush.bf16.msra.mxu0 %v402_v0  ;;  %403 = vmatpush.bf16.msra.mxu1 %v402_v0  ;;  %v399_v3 = vld [vmem:[%s493_s1 + $0x20] sm:$0xff]  ;;  %v398_v4 = vld [vmem:[%s493_s1 + $0x18] sm:$0xff]  ;;  %v397_v5 = vld [vmem:[%s493_s1 + $0x10] sm:$0xff]  ;;  %s348_s29 = sshll.u32 %s497_s22, 2 }
   0xd   : > { %v396_v6 = vld [vmem:[%s493_s1 + $0x8] sm:$0xff]  ;;  %v395_v7 = vld [vmem:[%s493_s1] sm:$0xff]  ;;  %s166_s7 = scalar_lea.vmem %s492_s0, %s348_s29  ;;  %s172_s13 = scalar_lea.vmem %s495_s3, %s348_s29 }
   0xe   : > { %v393_v8 = vld [vmem:[%s166_s7] sm:$0xff]  ;;  %v394_v9 = vld [vmem:[%s166_s7 + $0x8] sm:$0xff] }
   0xf   : > { %v419_v10 = vld [vmem:[%s494_s2] ss:$0 sm:$0xff] }
  0x10   : > { %259 = vmatpush.bf16.msra.mxu0 %v401_v1  ;;  %404 = vmatpush.bf16.msra.mxu1 %v401_v1 }
  0x14   : > { %260 = vmatpush.bf16.msra.mxu0 %v400_v2  ;;  %405 = vmatpush.bf16.msra.mxu1 %v400_v2 }
  0x18   : > { %261 = vmatpush.bf16.msra.mxu0 %v399_v3  ;;  %406 = vmatpush.bf16.msra.mxu1 %v399_v3 }
  0x1c   : > { %262 = vmatpush.bf16.msra.mxu0 %v398_v4  ;;  %407 = vmatpush.bf16.msra.mxu1 %v398_v4 }
  0x20   : > { %263 = vmatpush.bf16.msra.mxu0 %v397_v5  ;;  %408 = vmatpush.bf16.msra.mxu1 %v397_v5 }
  0x24   : > { %264 = vmatpush.bf16.msra.mxu0 %v396_v6  ;;  %409 = vmatpush.bf16.msra.mxu1 %v396_v6 }
  0x28   : > { %265 = vmatpush.bf16.msra.mxu0 %v395_v7  ;;  %410 = vmatpush.bf16.msra.mxu1 %v395_v7 }
  0x2b   : > { %266 = vmatmul.bf16.vlgmr.msra.gmra.mxu0 %v393_v8  ;;  %271 = vmatmul.bf16.vlgmr.msra.gmra.mxu1 %v394_v9 }
  0xa8   : > { %v267_v11 = vpop.f32.mrf.mxu0  ;;  %v272_v12 = vpop.f32.mrf.mxu1 }
  0xa9   : > { %v268_v13 = vadd.f32 %v419_v10, %v267_v11  ;;  %v273_v15 = vadd.f32 %v419_v10, %v272_v12 }
  0xab   : > { %v277_v14 = vpack.c.bf16 %v268_v13, %v268_v13  ;;  %v279_v21 = vpack.c.bf16 %v273_v15, %v273_v15 }
  0xad   : > { %282 = vst.msk [vmem:[%s172_s13] sm:$0xf] %vm281_vm0, %v277_v14 }
  0xae   : > { %284 = vst.msk [vmem:[%s172_s13 + $0x8] sm:$0xf] %vm281_vm0, %v279_v21 }
  0xb0   : > { %v269_v16 = vpop.f32.mrf.mxu0  ;;  %v274_v17 = vpop.f32.mrf.mxu1 }
  0xb1   : > { %v270_v18 = vadd.f32 %v419_v10, %v269_v16  ;;  %v275_v19 = vadd.f32 %v419_v10, %v274_v17 }
  0xb3   : > { %v278_v20 = vpack.c.bf16 %v270_v18, %v270_v18  ;;  %v280_v22 = vpack.c.bf16 %v275_v19, %v275_v19 }
  0xb5   : > { %283 = vst.msk [vmem:[%s172_s13 + $0x4] sm:$0xf] %vm281_vm0, %v278_v20 }
  0xb6   : > { %285 = vst.msk [vmem:[%s172_s13 + $0xc] sm:$0xf] %vm281_vm0, %v280_v22 }
  0xb7 PF: > { %s13_s12 = sadd.s32 1, %s426_s12  }
  0xb8   : > { %p10_p4 = scmp.ge.s32.totalorder %s13_s12, 4  }
  0xba   :  { %12 = sbr.rel (!%p10_p4) target bundleno = 1 (0x1), region = 62 }

// kernel: tpu_custom_call.1
= control target key start
LH: loop header
LB: loop body
LE: loop exit
PB: predicated region body
PF: predicated region fallthrough
CT: control target
= control target key end

     0   :  { %s448_s12 = smov 0   ;;  %s492_s0 = inlined_call_operand.vmem [shape: bf16[64,128], index: 0, kind: input, shape index: {}]   ;;  %s493_s1 = inlined_call_operand.vmem [shape: bf16[128,32], index: 1, kind: input, shape index: {}]   ;;  %s494_s2 = inlined_call_operand.vmem [shape: f32[1,32], index: 2, kind: input, shape index: {}]   ;;  %s495_s3 = inlined_call_operand.vmem [shape: bf16[64,32], index: 3, kind: output, shape index: {}]  }
   0x1 LB: > { %s342_s13 = sadd.s32 4294967295, %s426_s12   ;;  %p346_p0 = scmp.ge.s32.totalorder %s426_s12, 1  ;;  %s426_s12 = sphi %s448_s12, %s13_s12  }
   0x2   : > { %p138_p1 = scmp.lt.s32.totalorder %s426_s12, 3 }
   0x4   : > { %p139_p2 = pnand %p346_p0, %p138_p1 }
   0x5   : > { %s347_s22 = sshll.u32 (!%p139_p2), %s342_s13, 2 }
   0x6   : > { %142 = sbr.rel (%p139_p2) target bundleno = 183 (0xb7), region = 32  ;;  %p163_p3 = scmp.lt.s32.totalorder (!%p139_p2), %s347_s22, 7 }
   0xb   : > { %v402_v0 = vld [vmem:[%s493_s1 + $0x38] sm:$0xff]  ;;  %v401_v1 = vld [vmem:[%s493_s1 + $0x30] sm:$0xff]  ;;  %v400_v2 = vld [vmem:[%s493_s1 + $0x28] sm:$0xff]  ;;  %s497_s22 = smov (!%p163_p3, %s347_s22), 7  ;;  %vm281_vm0 = vcmask 257024  }
   0xc   : > { %258 = vmatpush.bf16.msra.mxu0 %v402_v0  ;;  %403 = vmatpush.bf16.msra.mxu1 %v402_v0  ;;  %v399_v3 = vld [vmem:[%s493_s1 + $0x20] sm:$0xff]  ;;  %v398_v4 = vld [vmem:[%s493_s1 + $0x18] sm:$0xff]  ;;  %v397_v5 = vld [vmem:[%s493_s1 + $0x10] sm:$0xff]  ;;  %s348_s29 = sshll.u32 %s497_s22, 2 }
   0xd   : > { %v396_v6 = vld [vmem:[%s493_s1 + $0x8] sm:$0xff]  ;;  %v395_v7 = vld [vmem:[%s493_s1] sm:$0xff]  ;;  %s166_s7 = scalar_lea.vmem %s492_s0, %s348_s29  ;;  %s172_s13 = scalar_lea.vmem %s495_s3, %s348_s29 }
   0xe   : > { %v393_v8 = vld [vmem:[%s166_s7] sm:$0xff]  ;;  %v394_v9 = vld [vmem:[%s166_s7 + $0x8] sm:$0xff] }
   0xf   : > { %v419_v10 = vld [vmem:[%s494_s2] ss:$0 sm:$0xff] }
  0x10   : > { %259 = vmatpush.bf16.msra.mxu0 %v401_v1  ;;  %404 = vmatpush.bf16.msra.mxu1 %v401_v1 }
  0x14   : > { %260 = vmatpush.bf16.msra.mxu0 %v400_v2  ;;  %405 = vmatpush.bf16.msra.mxu1 %v400_v2 }
  0x18   : > { %261 = vmatpush.bf16.msra.mxu0 %v399_v3  ;;  %406 = vmatpush.bf16.msra.mxu1 %v399_v3 }
  0x1c   : > { %262 = vmatpush.bf16.msra.mxu0 %v398_v4  ;;  %407 = vmatpush.bf16.msra.mxu1 %v398_v4 }
  0x20   : > { %263 = vmatpush.bf16.msra.mxu0 %v397_v5  ;;  %408 = vmatpush.bf16.msra.mxu1 %v397_v5 }
  0x24   : > { %264 = vmatpush.bf16.msra.mxu0 %v396_v6  ;;  %409 = vmatpush.bf16.msra.mxu1 %v396_v6 }
  0x28   : > { %265 = vmatpush.bf16.msra.mxu0 %v395_v7  ;;  %410 = vmatpush.bf16.msra.mxu1 %v395_v7 }
  0x2b   : > { %266 = vmatmul.bf16.vlgmr.msra.gmra.mxu0 %v393_v8  ;;  %271 = vmatmul.bf16.vlgmr.msra.gmra.mxu1 %v394_v9 }
  0xa8   : > { %v267_v11 = vpop.f32.mrf.mxu0  ;;  %v272_v12 = vpop.f32.mrf.mxu1 }
  0xa9   : > { %v268_v13 = vadd.f32 %v419_v10, %v267_v11  ;;  %v273_v15 = vadd.f32 %v419_v10, %v272_v12 }
  0xab   : > { %v277_v14 = vpack.c.bf16 %v268_v13, %v268_v13  ;;  %v279_v21 = vpack.c.bf16 %v273_v15, %v273_v15 }
  0xad   : > { %282 = vst.msk [vmem:[%s172_s13] sm:$0xf] %vm281_vm0, %v277_v14 }
  0xae   : > { %284 = vst.msk [vmem:[%s172_s13 + $0x8] sm:$0xf] %vm281_vm0, %v279_v21 }
  0xb0   : > { %v269_v16 = vpop.f32.mrf.mxu0  ;;  %v274_v17 = vpop.f32.mrf.mxu1 }
  0xb1   : > { %v270_v18 = vadd.f32 %v419_v10, %v269_v16  ;;  %v275_v19 = vadd.f32 %v419_v10, %v274_v17 }
  0xb3   : > { %v278_v20 = vpack.c.bf16 %v270_v18, %v270_v18  ;;  %v280_v22 = vpack.c.bf16 %v275_v19, %v275_v19 }
  0xb5   : > { %283 = vst.msk [vmem:[%s172_s13 + $0x4] sm:$0xf] %vm281_vm0, %v278_v20 }
  0xb6   : > { %285 = vst.msk [vmem:[%s172_s13 + $0xc] sm:$0xf] %vm281_vm0, %v280_v22 }
  0xb7 PF: > { %s13_s12 = sadd.s32 1, %s426_s12  }
  0xb8   : > { %p10_p4 = scmp.ge.s32.totalorder %s13_s12, 4  }
  0xba   :  { %12 = sbr.rel (!%p10_p4) target bundleno = 1 (0x1), region = 62 }

</bundles_post_ra>
